<compile_context>
chip_gen: v7x
topology: tpu7x:2x2x1
jax: 0.10.0
libtpu: 0.0.40
codegen_flags: <defaults>
</compile_context>

<pallas_src>
import math
from functools import partial

import jax
import jax.numpy as jnp
from jax.experimental import pallas as pl
from jax.experimental.pallas import tpu as pltpu


# VMEM budget for the double-buffered working set (output tile + lane-padded
# time tile).  24 MiB stays safely under the usable scoped VMEM on every
# generation once the limit is raised to 32 MiB (v5e/v6e physical 128 MiB,
# v7x physical 64 MiB; default scoped: v5e 16 MiB, v6e/v7x 32 MiB).
_VMEM_TILE_BUDGET = 24 << 20
_VMEM_LIMIT_BYTES = 32 << 20
_MAX_TB = 8192                   # row cap: lane-padded time tile = 4 MiB here
_MIN_ELEMS_FOR_PALLAS = 64 * 1024


def _sinusoid_pe_kernel(time_ref, freq_ref, out_ref, *, half_dim):
    """time_ref: (TB, 1) f32; freq_ref: (1, half_dim) f32; out_ref: (TB, out_dim)."""
    emb = time_ref[...] * freq_ref[...]          # (TB,1)*(1,half) -> (TB, half) f32
    # Explicit sin/cos (exact transcription of the torch module; no
    # sin(x + pi/2) folding).  Two static-slice stores: both are unmasked and
    # lane-dense when half_dim % 128 == 0 (i.e. out_dim % 256 == 0).
    # NOTE: jnp.sin/jnp.cos lower to a VPU range-reduction + polynomial (they
    # are not EUP ops); at realistic shapes this kernel is still HBM-writeback
    # bound on v5e/v6e — re-check the bundle before tuning further on v7x.
    out_ref[:, :half_dim] = jnp.sin(emb).astype(out_ref.dtype)
    out_ref[:, half_dim:] = jnp.cos(emb).astype(out_ref.dtype)


def _xla_reference(time, out_dim):
    """Direct transcription of the torch module (also the small-size fallback)."""
    half_dim = out_dim // 2
    scale = math.log(10000.0) / (half_dim - 1)
    freqs = jnp.exp(jnp.arange(half_dim, dtype=jnp.float32) * -scale)
    emb = time.astype(jnp.float32)[:, None] * freqs[None, :]
    return jnp.concatenate([jnp.sin(emb), jnp.cos(emb)], axis=-1)


def sinusoid_pe(time, out_dim, *, out_dtype=jnp.float32, block_b=None,
                force_pallas=False):
    """Pallas equivalent of SinusoidPE(out_dim).forward(time).

    Args:
        time: (batch,) array of timesteps (any numeric dtype).
        out_dim: even embedding dimension (>= 4).  out_dim % 256 == 0 gives
            fully unmasked lane-dense stores (fastest path).
        out_dtype: output dtype.  bf16 halves HBM writeback — use it whenever
            the consumer is bf16 (kernel is writeback-bound on v5e/v6e).
        block_b: optional batch-tile override (multiple of 8).
        force_pallas: bypass the small-size / alignment XLA fallback.
    Returns:
        (batch, out_dim) embedding: [sin(t*f), cos(t*f)] along the last axis.
    """
    assert out_dim % 2 == 0, "Output dimension of SinusoidalPE must be even."
    assert out_dim >= 4, "out_dim == 2 would divide by zero (half_dim - 1 == 0)."
    B = time.shape[0]
    half_dim = out_dim // 2
    out_bytes = jnp.dtype(out_dtype).itemsize

    # Pallas only pays off when there is real writeback volume AND the output
    # last dim is a lane multiple (otherwise masked vst.msk partial stores).
    use_pallas = force_pallas or (
        B * out_dim >= _MIN_ELEMS_FOR_PALLAS and out_dim % 128 == 0)
    if not use_pallas:
        return _xla_reference(time, out_dim).astype(out_dtype)

    # Host-side frequency table, hoisted out of the kernel (stays resident in
    # VMEM across all grid steps via the constant index_map).
    scale = math.log(10000.0) / (half_dim - 1)
    freqs = jnp.exp(
        jnp.arange(half_dim, dtype=jnp.float32) * -scale).reshape(1, half_dim)
    time2d = time.astype(jnp.float32).reshape(B, 1)

    # --- batch tile ---------------------------------------------------------
    # Per-buffer VMEM cost of one grid step:
    #   output tile : tb * out_dim * out_bytes
    #   time tile   : tb * 512 B   ((tb, 1) f32 pads to 128 lanes per sublane)
    # Both are double-buffered, so keep
    #   2 * tb * (out_dim*out_bytes + 512) <= _VMEM_TILE_BUDGET  (~24 MiB).
    if block_b is None:
        per_row = out_dim * out_bytes + 512
        tb = _VMEM_TILE_BUDGET // (2 * per_row)
        tb = max(8, min(_MAX_TB, (tb // 8) * 8))
    else:
        tb = block_b
    if tb >= B:
        tb = B                     # single block; full-extent block is legal
    grid = (pl.cdiv(B, tb),)

    cost = pl.CostEstimate(
        flops=2 * B * out_dim,
        transcendentals=B * out_dim,
        bytes_accessed=out_bytes * B * out_dim + 4 * (B + half_dim),
    )

    return pl.pallas_call(
        partial(_sinusoid_pe_kernel, half_dim=half_dim),
        out_shape=jax.ShapeDtypeStruct((B, out_dim), out_dtype),
        grid=grid,
        in_specs=[
            pl.BlockSpec((tb, 1), lambda i: (i, 0)),         # time tile
            pl.BlockSpec((1, half_dim), lambda i: (0, 0)),   # freqs (resident)
        ],
        out_specs=pl.BlockSpec((tb, out_dim), lambda i: (i, 0)),
        compiler_params=pltpu.CompilerParams(
            # On v7x, if a profile shows only one TensorCore busy, switch this
            # axis to pltpu.CORE_PARALLEL; "parallel" is the safe default on
            # single-TC v5e/v6e.
            dimension_semantics=("parallel",),
            vmem_limit_bytes=_VMEM_LIMIT_BYTES,
        ),
        cost_estimate=cost,
    )(time2d, freqs)


if __name__ == "__main__":
    key = jax.random.PRNGKey(0)

    # 1) Fully lane-dense path: out_dim % 256 == 0 -> unmasked full-vreg stores.
    batch, out_dim = 8, 256
    time = jax.random.uniform(key, (batch,), dtype=jnp.float32) * 1000.0
    out = jax.block_until_ready(sinusoid_pe(time, out_dim, force_pallas=True))
    ref = _xla_reference(time, out_dim)
    assert out.shape == (batch, out_dim)
    assert jnp.allclose(out, ref, atol=2e-4, rtol=2e-4), "mismatch vs reference (256)"

    # 2) out_dim % 256 != 0 path (masked half-width stores) still correct.
    batch2, out_dim2 = 16, 128
    time2 = jax.random.uniform(jax.random.PRNGKey(0), (batch2,),
                               dtype=jnp.float32) * 1000.0
    out2 = jax.block_until_ready(sinusoid_pe(time2, out_dim2, force_pallas=True))
    ref2 = _xla_reference(time2, out_dim2)
    assert out2.shape == (batch2, out_dim2)
    assert jnp.allclose(out2, ref2, atol=2e-4, rtol=2e-4), "mismatch vs reference (128)"

    print("KERNEL_OK")
</pallas_src>

<mosaic_0001>
module attributes {stable_mosaic.version = 11 : i64} {
  func.func @_sinusoid_pe_kernel(%arg0: i32, %arg1: memref<8x1xf32, #tpu.memory_space<vmem>>, %arg2: memref<1x128xf32, #tpu.memory_space<vmem>>, %arg3: memref<8x256xf32, #tpu.memory_space<vmem>>) attributes {dimension_semantics = [#tpu.dimension_semantics<parallel>], iteration_bounds = array<i64: 1>, scalar_prefetch = 0 : i64, scratch_operands = 0 : i64, tpu.core_type = #tpu.core_type<tc>, window_params = [{transform_indices = @transform_0, window_bounds = array<i64: 8, 1>}, {pipeline_mode = #tpu.pipeline_mode<synchronous>, transform_indices = @transform_1, window_bounds = array<i64: 1, 128>}, {transform_indices = @transform_2, window_bounds = array<i64: 8, 256>}]} {
    %c0 = arith.constant 0 : index
    %c0_0 = arith.constant 0 : index
    %0 = vector.load %arg1[%c0, %c0_0] : memref<8x1xf32, #tpu.memory_space<vmem>>, vector<8x1xf32>
    %c0_1 = arith.constant 0 : index
    %c0_2 = arith.constant 0 : index
    %1 = vector.load %arg2[%c0_1, %c0_2] : memref<1x128xf32, #tpu.memory_space<vmem>>, vector<1x128xf32>
    %2 = vector.broadcast %0 : vector<8x1xf32> to vector<8x128xf32>
    %3 = vector.broadcast %1 : vector<1x128xf32> to vector<8x128xf32>
    %4 = arith.mulf %2, %3 : vector<8x128xf32>
    %5 = math.sin %4 : vector<8x128xf32>
    %c0_3 = arith.constant 0 : index
    %c0_4 = arith.constant 0 : index
    %6 = vector.load %arg3[%c0_3, %c0_4] : memref<8x256xf32, #tpu.memory_space<vmem>>, vector<8x128xf32>
    tpu.vector_store %arg3[%c0_3, %c0_4], %5 {strides = array<i32>} : memref<8x256xf32, #tpu.memory_space<vmem>>, vector<8x128xf32>,
    %7 = math.cos %4 : vector<8x128xf32>
    %c0_5 = arith.constant 0 : index
    %c128 = arith.constant 128 : index
    %8 = vector.load %arg3[%c0_5, %c128] : memref<8x256xf32, #tpu.memory_space<vmem>>, vector<8x128xf32>
    tpu.vector_store %arg3[%c0_5, %c128], %7 {strides = array<i32>} : memref<8x256xf32, #tpu.memory_space<vmem>>, vector<8x128xf32>,
    return
  }
  func.func @transform_0(%arg0: i32) -> (i32, i32) {
    %c0_i32 = arith.constant 0 : i32
    %c0_i32_0 = arith.constant 0 : i32
    return %arg0, %c0_i32 : i32, i32
  }
  func.func @transform_1(%arg0: i32) -> (i32, i32) {
    %c0_i32 = arith.constant 0 : i32
    %c0_i32_0 = arith.constant 0 : i32
    %c0_i32_1 = arith.constant 0 : i32
    return %c0_i32, %c0_i32_0 : i32, i32
  }
  func.func @transform_2(%arg0: i32) -> (i32, i32) {
    %c0_i32 = arith.constant 0 : i32
    %c0_i32_0 = arith.constant 0 : i32
    return %arg0, %c0_i32 : i32, i32
  }
}

</mosaic_0001>

<bundles_post_ra>
// kernel: tpu_custom_call.1
= control target key start
LH: loop header
LB: loop body
LE: loop exit
PB: predicated region body
PF: predicated region fallthrough
CT: control target
= control target key end

     0   :  { %v299_v1 = vmov 0   ;;  %s361_s0 = inlined_call_operand.vmem [shape: f32[8,1], index: 0, kind: input, shape index: {}]   ;;  %s362_s1 = inlined_call_operand.vmem [shape: f32[1,128], index: 1, kind: input, shape index: {}]   ;;  %s363_s2 = inlined_call_operand.hbm [shape: f32[8,256], index: 2, kind: output, shape index: {}]  }
   0x1   :  { %v12_v0 = vld [vmem:[%s361_s0] sm:$0xff]  ;;  %270 = vset.pattern.permute.xlu0 %v299_v1 }
   0x2   :  { %16 = vperm.xlu0 %270, %v12_v0  }
   0x3   :  { %7 = vsyncpa [#allocation3], 0  ;;  %v249_v2 = vld [vmem:[%s362_s1] ss:$0 sm:$0xff]  ;;  %v300_v15 = vmov 683565275  }
   0x4   :  { %v301_v17 = vmov 2475754826   ;;  %v302_v20 = vmov 2131351028   ;;  %v303_v23 = vmov 2102212464  }
   0x5   :  { %v304_v26 = vmov 920167782   ;;  %v305_v29 = vmov 1326507024   ;;  %s306_s0 = smov [#allocation2]  }
   0x6   :  { %s241_s1 = sshll.u32 %s306_s0, 4  ;;  %s242_s1 = int_to_ptr.vmem [resolvable:$true] %s241_s1 }
   0x7   :  { %s275_s13 = scalar_lea.vmem %s242_s1, 256  ;;  %p280_p1 = scmp.lt.s32.totalorder %s242_s1, %s242_s1 }
   0x8   :  { %p276_p0 = scmp.ne.s32.totalorder %s242_s1, %s275_s13  ;;  %p281_p2 = scmp.lt.s32.totalorder %s275_s13, %s275_s13 }
   0xa   :  { %p282_p3 = por %p281_p2, %p280_p1 }
   0xc   :  { %p283_p4 = pnand %p282_p3, %p276_p0 }
  0x81   :  { %v17_v3 = vpop.permute.xlu0 %16 }
  0x82   :  { %v328_v4 = vmul.f32 %v249_v2, %v17_v3 }
  0x84   :  { %v29_v5 = vand.u32 2139095040, %v328_v4  ;;  %v26_v9 = vand.u32 2147483647, %v328_v4  ;;  %vm28_vm7 = vcmp.lt.s32.totalorder %v328_v4, 0  ;;  %vm118_vm15 = vweird.f32 %v328_v4 }
  0x86   :  { %v30_v6 = vshrl.u32 %v29_v5, 23  ;;  %v33_v12 = vand.u32 8388607, %v26_v9  ;;  %vm27_vm8 = vcmp.le.f32.partialorder %v26_v9, 0.7853982 }
  0x88   :  { %v250_v7 = vadd.s32 4294967169, %v30_v6  ;;  %v34_v31 = vor.u32 8388608, %v33_v12 }
  0x8a   :  { %v36_v8 = vadd.s32 1, %v250_v7  ;;  %v74_v45 = vshll.u32 %v34_v31, 8 }
  0x8c   :  { %vm37_vm0 = vcmp.gt.s32.totalorder %v36_v8, 0 }
  0x8d   :  { %v38_v10 = vsel %vm37_vm0, %v36_v8, 0 }
  0x8e   :  { %v40_v11 = vand.u32 31, %v38_v10  ;;  %v39_v14 = vshrl.u32 %v38_v10, 5 }
  0x90   :  { %v41_v13 = vsub.s32 32, %v40_v11  ;;  %v43_v16 = vshll.u32 %v300_v15, %v40_v11  ;;  %v46_v18 = vshll.u32 %v301_v17, %v40_v11  ;;  %v49_v22 = vshll.u32 %v302_v20, %v40_v11 }
  0x91   :  { %v52_v25 = vshll.u32 %v303_v23, %v40_v11  ;;  %v55_v28 = vshll.u32 %v304_v26, %v40_v11  ;;  %vm58_vm1 = vcmp.lt.s32.totalorder %v39_v14, 1  ;;  %vm61_vm2 = vcmp.lt.s32.totalorder %v39_v14, 4 }
  0x92   :  { %v44_v19 = vshrl.u32 %v301_v17, %v41_v13  ;;  %v47_v21 = vshrl.u32 %v302_v20, %v41_v13  ;;  %v50_v24 = vshrl.u32 %v303_v23, %v41_v13  ;;  %v53_v27 = vshrl.u32 %v304_v26, %v41_v13 }
  0x93   :  { %v56_v30 = vshrl.u32 %v305_v29, %v41_v13  ;;  %v42_v40 = vshrl.u32 %v300_v15, %v41_v13  ;;  %vm60_vm3 = vcmp.lt.s32.totalorder %v39_v14, 3  ;;  %vm59_vm4 = vcmp.lt.s32.totalorder %v39_v14, 2 }
  0x94   :  { %v45_v32 = vor.u32 %v44_v19, %v43_v16  ;;  %v48_v33 = vor.u32 %v47_v21, %v46_v18  ;;  %v51_v34 = vor.u32 %v50_v24, %v49_v22  ;;  %v54_v35 = vor.u32 %v53_v27, %v52_v25 }
  0x95   :  { %v57_v36 = vor.u32 %v56_v30, %v55_v28 }
  0x96   :  { %v63_v37 = vsel %vm61_vm2, %v51_v34, 2102212464  ;;  %v66_v38 = vsel %vm58_vm1, %v45_v32, %v48_v33  ;;  %v70_v39 = vsel %vm58_vm1, %v48_v33, %v51_v34  ;;  %v67_v41 = vsel %vm61_vm2, %v54_v35, 920167782 }
  0x97   :  { %v71_v42 = vsel %vm61_vm2, %v57_v36, 1326507024  ;;  %v68_v43 = vsel %vm60_vm3, %v51_v34, %v67_v41  ;;  %v62_v46 = vsel %vm58_vm1, %v42_v40, %v45_v32  ;;  %v64_v47 = vsel %vm60_vm3, %v48_v33, %v63_v37 }
  0x98   :  { %v72_v44 = vsel %vm60_vm3, %v54_v35, %v71_v42  ;;  %v69_v48 = vsel %vm59_vm4, %v66_v38, %v68_v43  ;;  %v65_v54 = vsel %vm59_vm4, %v62_v46, %v64_v47 }
  0x99   :  { %v73_v49 = vsel %vm59_vm4, %v70_v39, %v72_v44  ;;  %v337_v52 = vmul.u32.u64.low %v74_v45, %v69_v48  ;;  %v338_v53 = vmul.u32.u64.high %v74_v45, %v69_v48, %v337_v52  ;;  %v81_v56 = vmul.u32 %v74_v45, %v65_v54 }
  0x9a   :  { %v334_v50 = vmul.u32.u64.low %v74_v45, %v73_v49  ;;  %v335_v51 = vmul.u32.u64.high %v74_v45, %v73_v49, %v334_v50 }
  0x9b   :  { %v84_v55 = vadd.s32 1, %v338_v53 }
  0x9c   :  { %vm83_vm5 = vc.u32 %v335_v51, %v337_v52  ;;  %v82_v5 = vadd.s32 %v337_v52, %v335_v51 }
  0x9d   :  { %v85_v57 = vsel %vm83_vm5, %v84_v55, %v338_v53 }
  0x9e   :  { %v86_v58 = vadd.s32 %v85_v57, %v81_v56 }
  0xa0   :  { %v87_v59 = vadd.s32 536870912, %v86_v58 }
  0xa2   :  { %v88_v60 = vshrl.u32 %v87_v59, 30 }
  0xa4   :  { %v89_v61 = vshll.u32 %v88_v60, 30  ;;  %v112_v18 = vsub.s32 4, %v88_v60 }
  0xa6   :  { %v90_v62 = vsub.s32 %v86_v58, %v89_v61  ;;  %v113_v21 = vsel %vm28_vm7, %v112_v18, %v88_v60 }
  0xa7   :  { %v115_v23 = vsel %vm27_vm8, 0, %v113_v21 }
  0xa8   :  { %v92_v63 = vsub.s32 0, %v90_v62  ;;  %v119_v24 = vadd.s32 3, %v115_v23  ;;  %v224_v26 = vand.u32 3, %v115_v23 }
  0xaa   :  { %v251_v0 = vmin.u32 %v92_v63, %v90_v62  ;;  %v120_v25 = vand.u32 3, %v119_v24  ;;  %vm229_vm10 = vcmp.eq.s32.totalorder %v224_v26, 2  ;;  %vm226_vm12 = vcmp.eq.s32.totalorder %v224_v26, 0 }
  0xab   :  { %vm225_vm14 = vcmp.lt.s32.totalorder %v224_v26, 2 }
  0xac   :  { %v94_v1 = vclz %v251_v0  ;;  %vm125_vm9 = vcmp.eq.s32.totalorder %v120_v25, 2  ;;  %vm122_vm11 = vcmp.eq.s32.totalorder %v120_v25, 0  ;;  %vm121_vm13 = vcmp.lt.s32.totalorder %v120_v25, 2 }
  0xae   :  { %v252_v2 = vadd.s32 4294967294, %v94_v1 }
  0xb0   :  { %vm253_vm6 = vcmp.lt.s32.totalorder %v252_v2, 0 }
  0xb1   :  { %v97_v3 = vsel %vm253_vm6, 0, %v252_v2 }
  0xb2   :  { %v98_v6 = vsub.s32 32, %v97_v3  ;;  %v102_v7 = vsub.s32 4294967266, %v97_v3  ;;  %v99_v8 = vshll.u32 %v90_v62, %v97_v3 }
  0xb4   :  { %v100_v10 = vshrl.u32 %v82_v5, %v98_v6  ;;  %v103_v11 = vadd.s32 127, %v102_v7 }
  0xb6   :  { %v101_v12 = vor.u32 %v100_v10, %v99_v8  ;;  %v104_v13 = vshll.u32 %v103_v11, 23 }
  0xb8   :  { %v105_v14 = vor.u32 4788187, %v104_v13  ;;  %v108_v16 = vcvt.s32.f32 %v101_v12 }
  0xba   :  { %v106_v15 = vand.u32 2147483647, %v105_v14 }
  0xbc   :  { %v109_v17 = vmul.f32 %v108_v16, %v106_v15 }
  0xbe   :  { %v110_v19 = vxor.u32 2147483648, %v109_v17 }
  0xc0   :  { %v111_v20 = vsel %vm28_vm7, %v110_v19, %v109_v17 }
  0xc1   :  { %v114_v22 = vsel %vm27_vm8, %v328_v4, %v111_v20 }
  0xc2   :  { %271 = vcosq.f32 %v114_v22 }
  0xc3   :  { %273 = vsinq.f32 %v114_v22 }
  0xcc   :  { %v272_v27 = vpop.eup %271 }
  0xcd   :  { %v274_v28 = vpop.eup %273  ;;  %v126_v29 = vxor.u32 2147483648, %v272_v27 }
  0xce   :  { %v123_v30 = vxor.u32 2147483648, %v274_v28 }
  0xcf   :  { %v127_v9 = vsel %vm125_vm9, %v126_v29, %v274_v28  ;;  %v231_v31 = vsel %vm229_vm10, %v126_v29, %v274_v28 }
  0xd0   :  { %v124_v32 = vsel %vm122_vm11, %v272_v27, %v123_v30  ;;  %v228_v33 = vsel %vm226_vm12, %v272_v27, %v123_v30 }
  0xd1   :  { %v128_v34 = vsel %vm121_vm13, %v124_v32, %v127_v9  ;;  %v232_v35 = vsel %vm225_vm14, %v228_v33, %v231_v31 }
  0xd2   :  { %v129_v36 = vsel %vm118_vm15, nan, %v128_v34  ;;  %v233_v37 = vsel %vm118_vm15, nan, %v232_v35 }
  0xd3   :  { %130 = vst [vmem:[#allocation2] sm:$0xff] %v129_v36  ;;  %234 = vst [vmem:[#allocation2 + $0x8] sm:$0xff] %v233_v37 }
  0xd4   :  { %286 = shalt.err (!%p283_p4)
}
  0xd5   :  { %s287_s16 = scalar_lea.hbm %s363_s2, 256 }
  0xd6   :  { %p288_p5 = scmp.ne.s32.totalorder %s363_s2, %s287_s16  ;;  %p291_p6 = scmp.lt.u32.totalorder %s287_s16, %s363_s2 }
  0xd8   :  { %p293_p7 = pnand %p291_p6, %p288_p5 }
  0xda   :  { %296 = shalt.err (!%p293_p7)
}
  0xdb   :  { %244 = dma.vmem_to_hbm [thread:$0]  %s242_s1, 256, %s363_s2, [#allocation3]  }
  0xdc   :  { %297 = dma.done.wait [#allocation3], 256  }
  0xdd   :  { %298 = vsyncadd [#allocation3], 4294967040 }
  0xde   :  { %248 = vsyncpa [#allocation3], 1 }

</bundles_post_ra>
